<compile_context>
chip_gen: v7x
topology: tpu7x:2x2x1
jax: 0.10.0
libtpu: 0.0.40
codegen_flags: <defaults>
</compile_context>

<pallas_src>
import numpy as np
import jax
import jax.numpy as jnp
from jax.experimental import pallas as pl
from jax.experimental.pallas import tpu as pltpu


def _round_up(x, m):
    return (x + m - 1) // m * m


# ----------------------------------------------------------------------------
# Pallas kernel: tiled  out = field @ M + bias   (reduction over G tiles).
# The output block index is constant across k (the last grid axis), so it
# stays VMEM-resident and doubles as the f32 accumulator — no scratch needed.
# ----------------------------------------------------------------------------
def downscale_kernel(field_ref, m_ref, bias_ref, out_ref):
    # field_ref : (B_pad, tG)   field tile, VMEM (bf16 or f32)
    # m_ref     : (tG, tS)      fused gather+Linear matrix tile, VMEM
    # bias_ref  : (1,)          Linear bias, SMEM scalar
    # out_ref   : (B_pad, tS)   f32 output / accumulator tile, VMEM
    k = pl.program_id(1)

    @pl.when(k == 0)
    def _init():
        out_ref[...] = jnp.zeros_like(out_ref)

    out_ref[...] += jnp.dot(field_ref[...], m_ref[...],
                            preferred_element_type=jnp.float32)

    @pl.when(k == pl.num_programs(1) - 1)
    def _finalize():
        out_ref[...] += bias_ref[0]


# ----------------------------------------------------------------------------
# Tiling plan + one-time padding of the fused matrix (hoisted out of forward).
# ----------------------------------------------------------------------------
def make_plan(B, G, S, *, compute_dtype=jnp.bfloat16, tile_s=None,
              max_tile_g=2048):
    itemsize = np.dtype(compute_dtype).itemsize
    sublane = 8 if itemsize >= 4 else 16          # fill sublane groups / MXU M
    B_pad = max(_round_up(B, sublane), sublane)

    S_pad = _round_up(S, 128)                     # lane-dense output
    if tile_s is None:
        # 256 fills the 256-wide v6e/v7x MXU N dim and halves field re-streams;
        # 128 for the v5e MXU width or small station counts.
        tS = 256 if (S_pad >= 256 and S_pad % 256 == 0) else 128
    else:
        tS = tile_s
    tS = min(tS, S_pad)
    S_pad = _round_up(S_pad, tS)

    G_pad = _round_up(G, 128)
    tG = min(G_pad, _round_up(max_tile_g, 128))
    G_pad = _round_up(G_pad, tG)

    return dict(B=B, G=G, S=S, B_pad=B_pad, S_pad=S_pad, G_pad=G_pad,
                tS=tS, tG=tG, compute_dtype=compute_dtype, itemsize=itemsize)


def pad_fused_matrix(fused_m, plan):
    """Zero-pad + cast the fused gather@Linear matrix ONCE (not per call)."""
    G, S = plan["G"], plan["S"]
    m = jnp.asarray(fused_m, dtype=plan["compute_dtype"])
    return jnp.zeros((plan["G_pad"], plan["S_pad"]),
                     plan["compute_dtype"]).at[:G, :S].set(m)


# ----------------------------------------------------------------------------
# Forward: x (B, H, W) WRF field -> (B, S, 1), matching nn.Linear(K, 1) output.
# ----------------------------------------------------------------------------
def linear_downscaling_forward(x, m_pad, bias, plan):
    B, H, W = x.shape
    G = H * W
    assert B == plan["B"] and G == plan["G"], (x.shape, plan)
    B_pad, G_pad, S_pad = plan["B_pad"], plan["G_pad"], plan["S_pad"]
    tS, tG = plan["tS"], plan["tG"]
    cdt = plan["compute_dtype"]

    # Per-call padding limited to the small field operand; zeros contribute
    # nothing to the reduction.
    field = x.reshape(B, G).astype(cdt)
    field_pad = jnp.zeros((B_pad, G_pad), cdt).at[:B, :G].set(field)
    bias = bias.astype(jnp.float32)

    n_s_tiles = S_pad // tS
    n_g_tiles = G_pad // tG

    # Deeper buffering on the dominant (DMA-exposed) M stream when the
    # reduction actually has enough steps to pipeline.
    if n_g_tiles >= 3:
        m_spec = pl.BlockSpec((tG, tS), lambda j, k: (k, j),
                              pipeline_mode=pl.Buffered(3))
    else:
        m_spec = pl.BlockSpec((tG, tS), lambda j, k: (k, j))

    cost = pl.CostEstimate(
        flops=2 * B_pad * G_pad * S_pad,
        transcendentals=0,
        bytes_accessed=(B_pad * G_pad * plan["itemsize"] * n_s_tiles
                        + G_pad * S_pad * m_pad.dtype.itemsize
                        + B_pad * S_pad * 4))

    out = pl.pallas_call(
        downscale_kernel,
        out_shape=jax.ShapeDtypeStruct((B_pad, S_pad), jnp.float32),
        grid=(n_s_tiles, n_g_tiles),
        in_specs=[
            pl.BlockSpec((B_pad, tG), lambda j, k: (0, k)),
            m_spec,
            pl.BlockSpec(memory_space=pltpu.MemorySpace.SMEM),
        ],
        out_specs=pl.BlockSpec((B_pad, tS), lambda j, k: (0, j)),
        compiler_params=pltpu.CompilerParams(
            dimension_semantics=("parallel", "arbitrary"),
            vmem_limit_bytes=64 << 20),
        cost_estimate=cost,
    )(field_pad, m_pad, bias)

    return out[:plan["B"], :plan["S"], None]


# ----------------------------------------------------------------------------
# Parameter / metadata setup (deterministic, synthetic) + host fusion
# ----------------------------------------------------------------------------
def build_params(H, W, n_stations, n_neighbours, key):
    G = H * W
    K = n_neighbours

    # Synthetic "metadata": WRF grid coords (2, G) and station coords (S, 2).
    ys, xs = np.meshgrid(np.arange(H, dtype=np.float32),
                         np.arange(W, dtype=np.float32), indexing="ij")
    wrf_grid_coords = np.stack([xs.flatten(), ys.flatten()])          # (2, G)
    rng = np.random.RandomState(0)
    stations_coords = rng.uniform(0.0, min(H, W) - 1.0,
                                  size=(n_stations, 2)).astype(np.float32)

    # k-NN indices (mirrors the Interpolator's precomputed mapping).
    d2 = ((stations_coords[:, :, None] - wrf_grid_coords[None, :, :]) ** 2).sum(1)
    nn_idx = np.argsort(d2, axis=1)[:, :K]                            # (S, K)

    # nn.Linear(n_neighbours, 1) parameters, PyTorch-style uniform init.
    k1, k2 = jax.random.split(key)
    bound = 1.0 / np.sqrt(K)
    w = jax.random.uniform(k1, (K,), jnp.float32, -bound, bound)      # weight[0]
    bias = jax.random.uniform(k2, (1,), jnp.float32, -bound, bound)

    # Host-fused matrix M = one_hot_gather @ blockdiag(w): (G, S)
    #   M[nn_idx[s, k], s] += w[k]
    w_np = np.asarray(w)
    fused_m = np.zeros((G, n_stations), dtype=np.float32)
    np.add.at(fused_m,
              (nn_idx.flatten(), np.repeat(np.arange(n_stations), K)),
              np.tile(w_np, n_stations))

    return fused_m, bias, jnp.asarray(nn_idx), w


def reference_forward(x, nn_idx, w, bias):
    """Pure-JAX reference: gather K nearest grid values + Linear(K, 1)."""
    B, H, W = x.shape
    field = x.reshape(B, H * W)
    gathered = field[:, nn_idx]                      # (B, S, K)
    return (gathered * w[None, None, :]).sum(-1, keepdims=True) + bias[0]


# ----------------------------------------------------------------------------
if __name__ == "__main__":
    key = jax.random.PRNGKey(0)
    kx, kp, kx2 = jax.random.split(key, 3)

    # --- small case: f32 (tight structural check) + bf16 (default fast path) --
    B, H, W = 2, 16, 16
    n_stations, n_neighbours = 8, 4
    x = jax.random.normal(kx, (B, H, W), dtype=jnp.float32)
    fused_m, bias, nn_idx, w = build_params(H, W, n_stations, n_neighbours, kp)
    ref = reference_forward(x, nn_idx, w, bias)

    plan_f32 = make_plan(B, H * W, n_stations, compute_dtype=jnp.float32)
    m_f32 = pad_fused_matrix(fused_m, plan_f32)       # padded/cast ONCE
    out_f32 = jax.block_until_ready(
        linear_downscaling_forward(x, m_f32, bias, plan_f32))
    assert out_f32.shape == (B, n_stations, 1), out_f32.shape
    assert np.allclose(np.asarray(out_f32), np.asarray(ref),
                       rtol=1e-4, atol=1e-4)

    plan_bf16 = make_plan(B, H * W, n_stations, compute_dtype=jnp.bfloat16)
    m_bf16 = pad_fused_matrix(fused_m, plan_bf16)
    out_bf16 = jax.block_until_ready(
        linear_downscaling_forward(x, m_bf16, bias, plan_bf16))
    assert out_bf16.shape == (B, n_stations, 1), out_bf16.shape
    assert np.allclose(np.asarray(out_bf16), np.asarray(ref),
                       rtol=3e-2, atol=3e-2)

    # --- larger-G case: exercises the multi-tile reduction + Buffered(3) path --
    H2 = W2 = 64
    x2 = jax.random.normal(kx2, (B, H2, W2), dtype=jnp.float32)
    fused_m2, bias2, nn_idx2, w2 = build_params(H2, W2, n_stations,
                                                n_neighbours, kp)
    ref2 = reference_forward(x2, nn_idx2, w2, bias2)
    plan2 = make_plan(B, H2 * W2, n_stations,
                      compute_dtype=jnp.bfloat16, max_tile_g=1024)
    m2 = pad_fused_matrix(fused_m2, plan2)
    out2 = jax.block_until_ready(
        linear_downscaling_forward(x2, m2, bias2, plan2))
    assert out2.shape == (B, n_stations, 1), out2.shape
    assert np.allclose(np.asarray(out2), np.asarray(ref2),
                       rtol=3e-2, atol=3e-2)

    print("KERNEL_OK")
</pallas_src>

<mosaic_0001>
module attributes {stable_mosaic.version = 11 : i64} {
  func.func @downscale_kernel(%arg0: i32, %arg1: i32, %arg2: memref<8x256xf32, #tpu.memory_space<vmem>>, %arg3: memref<256x128xf32, #tpu.memory_space<vmem>>, %arg4: memref<1xf32, #tpu.memory_space<smem>>, %arg5: memref<8x128xf32, #tpu.memory_space<vmem>>) attributes {dimension_semantics = [#tpu.dimension_semantics<parallel>, #tpu.dimension_semantics<arbitrary>], iteration_bounds = array<i64: 1, 1>, scalar_prefetch = 0 : i64, scratch_operands = 0 : i64, tpu.core_type = #tpu.core_type<tc>, window_params = [{transform_indices = @transform_0, window_bounds = array<i64: 8, 256>}, {transform_indices = @transform_1, window_bounds = array<i64: 256, 128>}, {transform_indices = @transform_2, window_bounds = array<i64: 1>}, {transform_indices = @transform_3, window_bounds = array<i64: 8, 128>}]} {
    %c0_i32 = arith.constant 0 : i32
    %0 = arith.cmpi eq, %arg1, %c0_i32 : i32
    %1 = arith.extui %0 : i1 to i32
    %c0_i32_0 = arith.constant 0 : i32
    %2 = arith.cmpi ne, %1, %c0_i32_0 : i32
    scf.if %2 {
      %cst_10 = arith.constant 0.000000e+00 : f32
      %12 = vector.broadcast %cst_10 : f32 to vector<8x128xf32>
      %c0_11 = arith.constant 0 : index
      %c0_12 = arith.constant 0 : index
      %13 = vector.load %arg5[%c0_11, %c0_12] : memref<8x128xf32, #tpu.memory_space<vmem>>, vector<8x128xf32>
      tpu.vector_store %arg5[%c0_11, %c0_12], %12 {strides = array<i32>} : memref<8x128xf32, #tpu.memory_space<vmem>>, vector<8x128xf32>,
    } else {
    }
    %c0 = arith.constant 0 : index
    %c0_1 = arith.constant 0 : index
    %3 = vector.load %arg5[%c0, %c0_1] : memref<8x128xf32, #tpu.memory_space<vmem>>, vector<8x128xf32>
    %c0_2 = arith.constant 0 : index
    %c0_3 = arith.constant 0 : index
    %4 = vector.load %arg2[%c0_2, %c0_3] : memref<8x256xf32, #tpu.memory_space<vmem>>, vector<8x256xf32>
    %c0_4 = arith.constant 0 : index
    %c0_5 = arith.constant 0 : index
    %5 = vector.load %arg3[%c0_4, %c0_5] : memref<256x128xf32, #tpu.memory_space<vmem>>, vector<256x128xf32>
    %cst = arith.constant dense<0.000000e+00> : vector<8x128xf32>
    %6 = tpu.matmul %4, %5, %cst {dimension_numbers = #tpu.dot_dimension_numbers<[1], [0], [0], [1], [0, 0, 1, 1], [], []>} : vector<8x256xf32>, vector<256x128xf32>, vector<8x128xf32> -> vector<8x128xf32>
    %7 = arith.addf %3, %6 : vector<8x128xf32>
    %c0_6 = arith.constant 0 : index
    %c0_7 = arith.constant 0 : index
    %8 = vector.load %arg5[%c0_6, %c0_7] : memref<8x128xf32, #tpu.memory_space<vmem>>, vector<8x128xf32>
    tpu.vector_store %arg5[%c0_6, %c0_7], %7 {strides = array<i32>} : memref<8x128xf32, #tpu.memory_space<vmem>>, vector<8x128xf32>,
    %c0_i32_8 = arith.constant 0 : i32
    %9 = arith.cmpi eq, %arg1, %c0_i32_8 : i32
    %10 = arith.extui %9 : i1 to i32
    %c0_i32_9 = arith.constant 0 : i32
    %11 = arith.cmpi ne, %10, %c0_i32_9 : i32
    scf.if %11 {
      %c0_10 = arith.constant 0 : index
      %c0_11 = arith.constant 0 : index
      %12 = vector.load %arg5[%c0_10, %c0_11] : memref<8x128xf32, #tpu.memory_space<vmem>>, vector<8x128xf32>
      %c0_12 = arith.constant 0 : index
      %13 = memref.load %arg4[%c0_12] : memref<1xf32, #tpu.memory_space<smem>>
      %14 = vector.broadcast %13 : f32 to vector<8x128xf32>
      %15 = arith.addf %12, %14 : vector<8x128xf32>
      %c0_13 = arith.constant 0 : index
      %c0_14 = arith.constant 0 : index
      %16 = vector.load %arg5[%c0_13, %c0_14] : memref<8x128xf32, #tpu.memory_space<vmem>>, vector<8x128xf32>
      tpu.vector_store %arg5[%c0_13, %c0_14], %15 {strides = array<i32>} : memref<8x128xf32, #tpu.memory_space<vmem>>, vector<8x128xf32>,
    } else {
    }
    return
  }
  func.func @transform_0(%arg0: i32, %arg1: i32) -> (i32, i32) {
    %c0_i32 = arith.constant 0 : i32
    %c0_i32_0 = arith.constant 0 : i32
    return %c0_i32, %arg1 : i32, i32
  }
  func.func @transform_1(%arg0: i32, %arg1: i32) -> (i32, i32) {
    %c0_i32 = arith.constant 0 : i32
    return %arg1, %arg0 : i32, i32
  }
  func.func @transform_2(%arg0: i32, %arg1: i32) -> i32 {
    %c0_i32 = arith.constant 0 : i32
    %c0_i32_0 = arith.constant 0 : i32
    return %c0_i32 : i32
  }
  func.func @transform_3(%arg0: i32, %arg1: i32) -> (i32, i32) {
    %c0_i32 = arith.constant 0 : i32
    %c0_i32_0 = arith.constant 0 : i32
    return %c0_i32, %arg0 : i32, i32
  }
}

</mosaic_0001>

<bundles_post_ra>
// kernel: tpu_custom_call.1
= control target key start
LH: loop header
LB: loop body
LE: loop exit
PB: predicated region body
PF: predicated region fallthrough
CT: control target
= control target key end

     0   :  { %9 = vsyncpa [#allocation4], 0  ;;  %s394_s0 = inlined_call_operand.hbm [shape: f32[8,256], index: 0, kind: input, shape index: {}]   ;;  %s395_s1 = inlined_call_operand.hbm [shape: f32[256,128], index: 1, kind: input, shape index: {}]   ;;  %s396_s2 = inlined_call_operand.<no memory space> [shape: f32[1], index: 2, kind: input, shape index: {}]   ;;  %s397_s3 = inlined_call_operand.hbm [shape: f32[8,128], index: 3, kind: output, shape index: {}]  }
   0x1   :  { %10 = vsyncpa [#allocation7], 0 }
   0x2   :  { %11 = vsyncpa [#allocation5], 0  ;;  %s323_s12 = smov [#allocation3]   ;;  %s324_s14 = smov [#allocation6]  }
   0x3   :  { %s18_s13 = sshll.u32 %s323_s12, 4  ;;  %s27_s15 = sshll.u32 %s324_s14, 4  ;;  %s19_s13 = int_to_ptr.vmem [resolvable:$true] %s18_s13  ;;  %s348_s15 = int_to_ptr.vmem [resolvable:$true] %s27_s15 }
   0x4   :  { %s251_s18 = scalar_lea.hbm %s394_s0, 256 }
   0x5   :  { %p252_p0 = scmp.ne.s32.totalorder %s394_s0, %s251_s18  ;;  %p255_p1 = scmp.lt.u32.totalorder %s251_s18, %s394_s0 }
   0x7   :  { %p257_p2 = pnand %p255_p1, %p252_p0 }
   0x9   :  { %260 = shalt.err (!%p257_p2)
}
   0xa   :  { %s261_s23 = scalar_lea.vmem %s19_s13, 256  ;;  %p266_p4 = scmp.lt.s32.totalorder %s19_s13, %s19_s13 }
   0xb   :  { %p262_p3 = scmp.ne.s32.totalorder %s19_s13, %s261_s23  ;;  %p267_p5 = scmp.lt.s32.totalorder %s261_s23, %s261_s23 }
   0xd   :  { %p268_p6 = por %p267_p5, %p266_p4 }
   0xf   :  { %p269_p7 = pnand %p268_p6, %p262_p3 }
  0x11   :  { %272 = shalt.err (!%p269_p7)
}
  0x12   :  { %21 = dma.hbm_to_vmem [thread:$0]  %s394_s0, 256, %s19_s13, [#allocation4]  }
  0x13   :  { %s273_s28 = scalar_lea.hbm %s395_s1, 4096 }
  0x14   :  { %p274_p8 = scmp.ne.s32.totalorder %s395_s1, %s273_s28  ;;  %p277_p9 = scmp.lt.u32.totalorder %s273_s28, %s395_s1 }
  0x16   :  { %p279_p10 = pnand %p277_p9, %p274_p8 }
  0x18   :  { %282 = shalt.err (!%p279_p10)
}
  0x19   :  { %s283_s6 = scalar_lea.vmem %s348_s15, 4096  ;;  %p288_p12 = scmp.lt.s32.totalorder %s348_s15, %s348_s15 }
  0x1a   :  { %p284_p11 = scmp.ne.s32.totalorder %s348_s15, %s283_s6  ;;  %p289_p13 = scmp.lt.s32.totalorder %s283_s6, %s283_s6 }
  0x1c   :  { %p290_p0 = por %p289_p13, %p288_p12 }
  0x1e   :  { %p291_p1 = pnand %p290_p0, %p284_p11 }
  0x20   :  { %294 = shalt.err (!%p291_p1)
}
  0x21   :  { %s325_s0 = smov 128   ;;  %s326_s7 = smov 8  }
  0x22   :  { %33 = dma.hbm_to_vmem [thread:$0]  %s395_s1, 4096, %s348_s15, [#allocation7], %s325_s0, %s325_s0, %s326_s7  }
  0x23   :  { %317 = dma.done.wait [#allocation4], 256  }
  0x24   :  { %318 = vsyncadd [#allocation4], 4294967040 }
  0x25   :  { %319 = dma.done.wait [#allocation7], 4096  }
  0x26   :  { %320 = vsyncadd [#allocation7], 4294963200  ;;  %v66_v0 = vld [vmem:[#allocation6 + $0x80] sm:$0xff]  ;;  %v67_v1 = vld [vmem:[#allocation6 + $0x88] sm:$0xff]  ;;  %v159_v53 = vstv %s396_s2  ;;  %s327_s11 = smov [#allocation8]  }
  0x27   :  { %v50_v2 = vld [vmem:[#allocation6] sm:$0xff]  ;;  %v213_v3 = vpack.c.bf16 %v67_v1, %v66_v0  ;;  %v51_v4 = vld [vmem:[#allocation6 + $0x8] sm:$0xff]  ;;  %v68_v5 = vld [vmem:[#allocation6 + $0x90] sm:$0xff]  ;;  %s168_s12 = sshll.u32 %s327_s11, 4  ;;  %s169_s12 = int_to_ptr.vmem [resolvable:$true] %s168_s12 }
  0x28   :  { %v69_v6 = vld [vmem:[#allocation6 + $0x98] sm:$0xff]  ;;  %v215_v7 = vpack.c.bf16 %v51_v4, %v50_v2  ;;  %v52_v9 = vld [vmem:[#allocation6 + $0x10] sm:$0xff]  ;;  %v70_v11 = vld [vmem:[#allocation6 + $0xa0] sm:$0xff]  ;;  %s295_s13 = scalar_lea.vmem %s169_s12, 128  ;;  %p300_p3 = scmp.lt.s32.totalorder %s169_s12, %s169_s12 }
  0x29   :  { %v217_v8 = vpack.c.bf16 %v69_v6, %v68_v5  ;;  %v53_v10 = vld [vmem:[#allocation6 + $0x18] sm:$0xff]  ;;  %214 = vmatprep.subr.bf16.mxu0 %v213_v3  ;;  %v71_v12 = vld [vmem:[#allocation6 + $0xa8] sm:$0xff]  ;;  %v54_v15 = vld [vmem:[#allocation6 + $0x20] sm:$0xff]  ;;  %p296_p2 = scmp.ne.s32.totalorder %s169_s12, %s295_s13  ;;  %p301_p4 = scmp.lt.s32.totalorder %s295_s13, %s295_s13 }
  0x2a   :  { %216 = vmatpush3.bf16.msra.mxu0 %v215_v7  ;;  %v219_v13 = vpack.c.bf16 %v53_v10, %v52_v9  ;;  %v221_v14 = vpack.c.bf16 %v71_v12, %v70_v11  ;;  %v55_v16 = vld [vmem:[#allocation6 + $0x28] sm:$0xff]  ;;  %v72_v17 = vld [vmem:[#allocation6 + $0xb0] sm:$0xff]  ;;  %v73_v18 = vld [vmem:[#allocation6 + $0xb8] sm:$0xff] }
  0x2b   :  { %218 = vmatprep.subr.bf16.mxu0 %v217_v8  ;;  %v223_v19 = vpack.c.bf16 %v55_v16, %v54_v15  ;;  %v225_v20 = vpack.c.bf16 %v73_v18, %v72_v17  ;;  %v56_v21 = vld [vmem:[#allocation6 + $0x30] sm:$0xff]  ;;  %v57_v22 = vld [vmem:[#allocation6 + $0x38] sm:$0xff]  ;;  %v74_v23 = vld [vmem:[#allocation6 + $0xc0] sm:$0xff]  ;;  %p302_p5 = por %p301_p4, %p300_p3 }
  0x2c   :  { %v75_v24 = vld [vmem:[#allocation6 + $0xc8] sm:$0xff]  ;;  %v49_v25 = vld [vmem:[#allocation3 + $0x8] sm:$0xff]  ;;  %v227_v26 = vpack.c.bf16 %v57_v22, %v56_v21  ;;  %v58_v28 = vld [vmem:[#allocation6 + $0x40] sm:$0xff] }
  0x2d   :  { %146 = vmatprep.mubr.f32.mxu0 %v49_v25  ;;  %v229_v27 = vpack.c.bf16 %v75_v24, %v74_v23  ;;  %v59_v29 = vld [vmem:[#allocation6 + $0x48] sm:$0xff]  ;;  %v76_v30 = vld [vmem:[#allocation6 + $0xd0] sm:$0xff]  ;;  %v77_v31 = vld [vmem:[#allocation6 + $0xd8] sm:$0xff]  ;;  %p303_p6 = pnand %p302_p5, %p296_p2 }
  0x2e   :  { %220 = vmatpush3.bf16.msra.mxu0 %v219_v13  ;;  %v231_v32 = vpack.c.bf16 %v59_v29, %v58_v28  ;;  %v233_v33 = vpack.c.bf16 %v77_v31, %v76_v30  ;;  %v60_v34 = vld [vmem:[#allocation6 + $0x50] sm:$0xff]  ;;  %v61_v35 = vld [vmem:[#allocation6 + $0x58] sm:$0xff]  ;;  %v78_v36 = vld [vmem:[#allocation6 + $0xe0] sm:$0xff] }
  0x2f   :  { %222 = vmatprep.subr.bf16.mxu0 %v221_v14  ;;  %v79_v37 = vld [vmem:[#allocation6 + $0xe8] sm:$0xff]  ;;  %v235_v38 = vpack.c.bf16 %v61_v35, %v60_v34  ;;  %v62_v40 = vld [vmem:[#allocation6 + $0x60] sm:$0xff]  ;;  %v80_v42 = vld [vmem:[#allocation6 + $0xf0] sm:$0xff] }
  0x30   :  { %v237_v39 = vpack.c.bf16 %v79_v37, %v78_v36  ;;  %v63_v41 = vld [vmem:[#allocation6 + $0x68] sm:$0xff]  ;;  %v81_v43 = vld [vmem:[#allocation6 + $0xf8] sm:$0xff]  ;;  %v64_v46 = vld [vmem:[#allocation6 + $0x70] sm:$0xff] }
  0x31   :  { %v239_v44 = vpack.c.bf16 %v63_v41, %v62_v40  ;;  %v241_v45 = vpack.c.bf16 %v81_v43, %v80_v42  ;;  %v65_v47 = vld [vmem:[#allocation6 + $0x78] sm:$0xff]  ;;  %v48_v49 = vld [vmem:[#allocation3] sm:$0xff] }
  0x32   :  { %224 = vmatpush3.bf16.msra.mxu0 %v223_v19  ;;  %v243_v48 = vpack.c.bf16 %v65_v47, %v64_v46 }
  0x33   :  { %226 = vmatprep.subr.bf16.mxu0 %v225_v20 }
  0x36   :  { %228 = vmatpush3.bf16.msra.mxu0 %v227_v26 }
  0x37   :  { %230 = vmatprep.subr.bf16.mxu0 %v229_v27 }
  0x3a   :  { %232 = vmatpush3.bf16.msra.mxu0 %v231_v32 }
  0x3b   :  { %234 = vmatprep.subr.bf16.mxu0 %v233_v33 }
  0x3e   :  { %236 = vmatpush3.bf16.msra.mxu0 %v235_v38 }
  0x3f   :  { %238 = vmatprep.subr.bf16.mxu0 %v237_v39 }
  0x42   :  { %240 = vmatpush3.bf16.msra.mxu0 %v239_v44 }
  0x43   :  { %242 = vmatprep.subr.bf16.mxu0 %v241_v45 }
  0x46   :  { %244 = vmatpush3.bf16.msra.mxu0 %v243_v48 }
  0x49   :  { %147 = vmatmul.mubr.f32.vlgmr.msra.gmra.mrb[0].mxu0 %v48_v49 }
 0x11c   :  { %v210_v50 = vpop.f32.mrb[0].mxu0 }
 0x11d   :  { %v211_v51 = vpop.f32.mrb[1].mxu0 }
 0x11e   :  { %v212_v52 = vadd.f32 %v211_v51, %v210_v50 }
 0x120   :  { %v160_v54 = vadd.f32 %v212_v52, %v159_v53 }
 0x122   :  { %161 = vst [vmem:[#allocation8] sm:$0xff] %v160_v54 }
 0x123   :  { %306 = shalt.err (!%p303_p6)
}
 0x124   :  { %s307_s16 = scalar_lea.hbm %s397_s3, 128 }
 0x125   :  { %p308_p7 = scmp.ne.s32.totalorder %s397_s3, %s307_s16  ;;  %p311_p8 = scmp.lt.u32.totalorder %s307_s16, %s397_s3 }
 0x127   :  { %p313_p9 = pnand %p311_p8, %p308_p7 }
 0x129   :  { %316 = shalt.err (!%p313_p9)
}
 0x12a   :  { %171 = dma.vmem_to_hbm [thread:$0]  %s169_s12, 128, %s397_s3, [#allocation5]  }
 0x12b   :  { %321 = dma.done.wait [#allocation5], 128  }
 0x12c   :  { %322 = vsyncadd [#allocation5], 4294967168 }
 0x12d   :  { %175 = vsyncpa [#allocation4], 1 }
 0x12e   :  { %176 = vsyncpa [#allocation7], 1 }
 0x12f   :  { %177 = vsyncpa [#allocation5], 1 }

</bundles_post_ra>
